<compile_context>
chip_gen: v7x
topology: tpu7x:2x2x1
jax: 0.10.0
libtpu: 0.0.40
codegen_flags: <defaults>
</compile_context>

<pallas_src>
import functools

import jax
import jax.numpy as jnp
from jax import lax
from jax.experimental import pallas as pl
from jax.experimental.pallas import tpu as pltpu


def _triplet_cos_loss_kernel(a_ref, p_ref, n_ref, o_ref, *, true_b, block_rows):
    """Partial hinge-sum for one (block_rows, D) batch tile."""
    i = pl.program_id(0)

    a = a_ref[...].astype(jnp.float32)
    p = p_ref[...].astype(jnp.float32)
    n = n_ref[...].astype(jnp.float32)

    # Row-wise dots / squared norms (lane-axis reductions) -> (TB, 1).
    dot_ap = jnp.sum(a * p, axis=-1, keepdims=True)
    dot_an = jnp.sum(a * n, axis=-1, keepdims=True)
    sq_a = jnp.sum(a * a, axis=-1, keepdims=True)
    sq_p = jnp.sum(p * p, axis=-1, keepdims=True)
    sq_n = jnp.sum(n * n, axis=-1, keepdims=True)

    # rsqrt runs on the EUP slot; avoids 3 sqrts + 2 divides on the VPU.
    inv_a = lax.rsqrt(sq_a)
    inv_p = lax.rsqrt(sq_p)
    inv_n = lax.rsqrt(sq_n)

    # matched - mismatched1 = cos_an - cos_ap = (dot_an*inv_n - dot_ap*inv_p)*inv_a
    delta = (dot_an * inv_n - dot_ap * inv_p) * inv_a
    hinge = 0.5 * jnp.maximum(0.5 + delta, 0.0)               # (TB, 1)

    # Mask padded tail rows (their 0/0 -> NaN must not reach the sum).
    row = i * block_rows + lax.broadcasted_iota(jnp.int32, hinge.shape, 0)
    hinge = jnp.where(row < true_b, hinge, 0.0)

    # Lane/sublane-dense partial-sum tile for this block.
    o_ref[...] = jnp.full(o_ref.shape, jnp.sum(hinge), dtype=jnp.float32)


def triplet_cosine_loss(anchor, positive, negative, *, block_rows=None):
    """anchor/positive/negative: (B, D) arrays. Returns scalar float32 loss."""
    assert anchor.shape == positive.shape == negative.shape
    assert anchor.ndim == 2
    b, d = anchor.shape
    itemsize = jnp.dtype(anchor.dtype).itemsize

    if block_rows is None:
        # 3 inputs x 2 pipeline buffers x (TB x D x itemsize) <= ~12 MiB keeps
        # the default double-buffered pipeline inside every generation's
        # scoped-VMEM default (v5e 16 MiB is the smallest).
        budget = 12 * 1024 * 1024
        block_rows = budget // (3 * 2 * d * itemsize)
        block_rows = min(block_rows, 1024)
    # Don't tile beyond the (8-rounded) batch, keep a multiple of 8 sublanes.
    block_rows = min(block_rows, (b + 7) // 8 * 8)
    block_rows = max(8, block_rows // 8 * 8)

    n_blocks = pl.cdiv(b, block_rows)
    b_pad = n_blocks * block_rows
    if b_pad != b:
        pad = lambda x: jnp.pad(x, ((0, b_pad - b), (0, 0)))
        anchor, positive, negative = pad(anchor), pad(positive), pad(negative)

    kernel = functools.partial(
        _triplet_cos_loss_kernel, true_b=b, block_rows=block_rows)

    in_spec = pl.BlockSpec((block_rows, d), lambda i: (i, 0))
    partials = pl.pallas_call(
        kernel,
        out_shape=jax.ShapeDtypeStruct((n_blocks, 8, 128), jnp.float32),
        grid_spec=pltpu.PrefetchScalarGridSpec(
            num_scalar_prefetch=0,
            grid=(n_blocks,),
            in_specs=[in_spec, in_spec, in_spec],
            out_specs=pl.BlockSpec((1, 8, 128), lambda i: (i, 0, 0)),
        ),
        compiler_params=pltpu.CompilerParams(
            dimension_semantics=("parallel",)),
    )(anchor, positive, negative)

    # Tiny final reduce + divide by the *true* batch size in plain JAX.
    return jnp.sum(partials[:, 0, 0]) / b


def _reference_loss(anchor, positive, negative):
    """Pure-JAX reference mirroring the PyTorch forward."""
    def cos(x, y):
        return jnp.sum(x * y, -1) / (
            jnp.linalg.norm(x, axis=-1) * jnp.linalg.norm(y, axis=-1))
    matched = 1.0 - cos(anchor, positive)
    mismatched1 = 1.0 - cos(anchor, negative)
    dist_hinge = 0.5 * jnp.maximum(0.5 + matched - mismatched1, 0.0)
    return jnp.mean(dist_hinge)


if __name__ == "__main__":
    key = jax.random.PRNGKey(0)

    # Test 1: small aligned batch, single block.
    B, D = 8, 32
    ka, kp, kn = jax.random.split(key, 3)
    anchor = jax.random.normal(ka, (B, D), dtype=jnp.float32)
    positive = jax.random.normal(kp, (B, D), dtype=jnp.float32)
    negative = jax.random.normal(kn, (B, D), dtype=jnp.float32)

    loss = triplet_cosine_loss(anchor, positive, negative)
    jax.block_until_ready(loss)
    ref = _reference_loss(anchor, positive, negative)
    assert jnp.allclose(loss, ref, atol=1e-5, rtol=1e-5), (loss, ref)

    # Test 2: ragged batch (tail masking) across multiple grid blocks.
    B2 = 13
    k2a, k2p, k2n = jax.random.split(jax.random.PRNGKey(1), 3)
    a2 = jax.random.normal(k2a, (B2, D), dtype=jnp.float32)
    p2 = jax.random.normal(k2p, (B2, D), dtype=jnp.float32)
    n2 = jax.random.normal(k2n, (B2, D), dtype=jnp.float32)

    loss2 = triplet_cosine_loss(a2, p2, n2, block_rows=8)  # 2 blocks + masked tail
    jax.block_until_ready(loss2)
    ref2 = _reference_loss(a2, p2, n2)
    assert jnp.allclose(loss2, ref2, atol=1e-5, rtol=1e-5), (loss2, ref2)

    print("KERNEL_OK")
</pallas_src>

<mosaic_0001>
module attributes {stable_mosaic.version = 11 : i64} {
  func.func @_triplet_cos_loss_kernel(%arg0: i32, %arg1: memref<8x32xf32, #tpu.memory_space<vmem>>, %arg2: memref<8x32xf32, #tpu.memory_space<vmem>>, %arg3: memref<8x32xf32, #tpu.memory_space<vmem>>, %arg4: memref<1x8x128xf32, #tpu.memory_space<vmem>>) attributes {dimension_semantics = [#tpu.dimension_semantics<parallel>], iteration_bounds = array<i64: 1>, scalar_prefetch = 0 : i64, scratch_operands = 0 : i64, tpu.core_type = #tpu.core_type<tc>, window_params = [{transform_indices = @transform_0, window_bounds = array<i64: 8, 32>}, {transform_indices = @transform_1, window_bounds = array<i64: 8, 32>}, {transform_indices = @transform_2, window_bounds = array<i64: 8, 32>}, {transform_indices = @transform_3, window_bounds = array<i64: 1, 8, 128>}]} {
    %c0 = arith.constant 0 : index
    %c0_0 = arith.constant 0 : index
    %0 = vector.load %arg1[%c0, %c0_0] : memref<8x32xf32, #tpu.memory_space<vmem>>, vector<8x32xf32>
    %c0_1 = arith.constant 0 : index
    %c0_2 = arith.constant 0 : index
    %1 = vector.load %arg2[%c0_1, %c0_2] : memref<8x32xf32, #tpu.memory_space<vmem>>, vector<8x32xf32>
    %c0_3 = arith.constant 0 : index
    %c0_4 = arith.constant 0 : index
    %2 = vector.load %arg3[%c0_3, %c0_4] : memref<8x32xf32, #tpu.memory_space<vmem>>, vector<8x32xf32>
    %3 = arith.mulf %0, %1 : vector<8x32xf32>
    %cst = arith.constant dense<0.000000e+00> : vector<8xf32>
    %4 = vector.multi_reduction <add>, %3, %cst [1] : vector<8x32xf32> to vector<8xf32>
    %5 = vector.shape_cast %4 : vector<8xf32> to vector<8x1xf32>
    %6 = arith.mulf %0, %2 : vector<8x32xf32>
    %cst_5 = arith.constant dense<0.000000e+00> : vector<8xf32>
    %7 = vector.multi_reduction <add>, %6, %cst_5 [1] : vector<8x32xf32> to vector<8xf32>
    %8 = vector.shape_cast %7 : vector<8xf32> to vector<8x1xf32>
    %9 = arith.mulf %0, %0 : vector<8x32xf32>
    %cst_6 = arith.constant dense<0.000000e+00> : vector<8xf32>
    %10 = vector.multi_reduction <add>, %9, %cst_6 [1] : vector<8x32xf32> to vector<8xf32>
    %11 = vector.shape_cast %10 : vector<8xf32> to vector<8x1xf32>
    %12 = arith.mulf %1, %1 : vector<8x32xf32>
    %cst_7 = arith.constant dense<0.000000e+00> : vector<8xf32>
    %13 = vector.multi_reduction <add>, %12, %cst_7 [1] : vector<8x32xf32> to vector<8xf32>
    %14 = vector.shape_cast %13 : vector<8xf32> to vector<8x1xf32>
    %15 = arith.mulf %2, %2 : vector<8x32xf32>
    %cst_8 = arith.constant dense<0.000000e+00> : vector<8xf32>
    %16 = vector.multi_reduction <add>, %15, %cst_8 [1] : vector<8x32xf32> to vector<8xf32>
    %17 = vector.shape_cast %16 : vector<8xf32> to vector<8x1xf32>
    %18 = math.rsqrt %11 : vector<8x1xf32>
    %19 = math.rsqrt %14 : vector<8x1xf32>
    %20 = math.rsqrt %17 : vector<8x1xf32>
    %21 = arith.mulf %8, %20 : vector<8x1xf32>
    %22 = arith.mulf %5, %19 : vector<8x1xf32>
    %23 = arith.subf %21, %22 : vector<8x1xf32>
    %24 = arith.mulf %23, %18 : vector<8x1xf32>
    %cst_9 = arith.constant 5.000000e-01 : f32
    %25 = vector.broadcast %cst_9 : f32 to vector<8x1xf32>
    %26 = arith.addf %25, %24 : vector<8x1xf32>
    %cst_10 = arith.constant 0.000000e+00 : f32
    %27 = vector.broadcast %cst_10 : f32 to vector<8x1xf32>
    %28 = arith.maximumf %26, %27 : vector<8x1xf32>
    %cst_11 = arith.constant 5.000000e-01 : f32
    %29 = vector.broadcast %cst_11 : f32 to vector<8x1xf32>
    %30 = arith.mulf %29, %28 : vector<8x1xf32>
    %c8_i32 = arith.constant 8 : i32
    %31 = arith.muli %arg0, %c8_i32 : i32
    %32 = tpu.iota {dimensions = array<i32: 0>} : vector<8x1xi32>
    %33 = vector.broadcast %31 : i32 to vector<8x1xi32>
    %34 = arith.addi %33, %32 : vector<8x1xi32>
    %c8_i32_12 = arith.constant 8 : i32
    %35 = vector.broadcast %c8_i32_12 : i32 to vector<8x1xi32>
    %36 = arith.cmpi slt, %34, %35 : vector<8x1xi32>
    %cst_13 = arith.constant 0.000000e+00 : f32
    %37 = vector.broadcast %cst_13 : f32 to vector<8x1xf32>
    %38 = arith.select %36, %30, %37 : vector<8x1xi1>, vector<8x1xf32>
    %39 = vector.shape_cast %38 : vector<8x1xf32> to vector<1x8x1xf32>
    %cst_14 = arith.constant dense<0.000000e+00> : vector<1xf32>
    %40 = vector.multi_reduction <add>, %39, %cst_14 [1, 2] : vector<1x8x1xf32> to vector<1xf32>
    %41 = vector.shape_cast %40 : vector<1xf32> to vector<1x1x1xf32>
    %42 = vector.extract %41[0, 0, 0] : f32 from vector<1x1x1xf32>
    %43 = vector.broadcast %42 : f32 to vector<1x8x128xf32>
    %c0_15 = arith.constant 0 : index
    %c0_16 = arith.constant 0 : index
    %c0_17 = arith.constant 0 : index
    %44 = vector.load %arg4[%c0_15, %c0_16, %c0_17] : memref<1x8x128xf32, #tpu.memory_space<vmem>>, vector<1x8x128xf32>
    tpu.vector_store %arg4[%c0_15, %c0_16, %c0_17], %43 {strides = array<i32>} : memref<1x8x128xf32, #tpu.memory_space<vmem>>, vector<1x8x128xf32>,
    return
  }
  func.func @transform_0(%arg0: i32) -> (i32, i32) {
    %c0_i32 = arith.constant 0 : i32
    %c0_i32_0 = arith.constant 0 : i32
    return %arg0, %c0_i32 : i32, i32
  }
  func.func @transform_1(%arg0: i32) -> (i32, i32) {
    %c0_i32 = arith.constant 0 : i32
    %c0_i32_0 = arith.constant 0 : i32
    return %arg0, %c0_i32 : i32, i32
  }
  func.func @transform_2(%arg0: i32) -> (i32, i32) {
    %c0_i32 = arith.constant 0 : i32
    %c0_i32_0 = arith.constant 0 : i32
    return %arg0, %c0_i32 : i32, i32
  }
  func.func @transform_3(%arg0: i32) -> (i32, i32, i32) {
    %c0_i32 = arith.constant 0 : i32
    %c0_i32_0 = arith.constant 0 : i32
    %c0_i32_1 = arith.constant 0 : i32
    return %arg0, %c0_i32, %c0_i32_0 : i32, i32, i32
  }
}

</mosaic_0001>

<bundles_post_ra>
// kernel: tpu_custom_call.1
= control target key start
LH: loop header
LB: loop body
LE: loop exit
PB: predicated region body
PF: predicated region fallthrough
CT: control target
= control target key end

     0   :  { %8 = vsyncpa [#allocation3], 0  ;;  %s303_s0 = inlined_call_operand.hbm [shape: f32[8,32], index: 0, kind: input, shape index: {}]   ;;  %s304_s1 = inlined_call_operand.hbm [shape: f32[8,32], index: 1, kind: input, shape index: {}]   ;;  %s305_s2 = inlined_call_operand.hbm [shape: f32[8,32], index: 2, kind: input, shape index: {}]   ;;  %s306_s3 = inlined_call_operand.hbm [shape: f32[1,8,128], index: 3, kind: output, shape index: {}]  }
   0x1   :  { %9 = vsyncpa [#allocation6], 0 }
   0x2   :  { %10 = vsyncpa [#allocation4], 0  ;;  %s226_s12 = smov [#allocation5]   ;;  %s227_s14 = smov [#allocation2]  }
   0x3   :  { %s27_s13 = sshll.u32 %s226_s12, 4  ;;  %s17_s15 = sshll.u32 %s227_s14, 4  ;;  %s28_s13 = int_to_ptr.vmem [resolvable:$true] %s27_s13  ;;  %s18_s15 = int_to_ptr.vmem [resolvable:$true] %s17_s15 }
   0x4   :  { %s132_s18 = scalar_lea.hbm %s304_s1, 128 }
   0x5   :  { %p133_p0 = scmp.ne.s32.totalorder %s304_s1, %s132_s18  ;;  %p136_p1 = scmp.lt.u32.totalorder %s132_s18, %s304_s1 }
   0x7   :  { %p138_p2 = pnand %p136_p1, %p133_p0 }
   0x9   :  { %141 = shalt.err (!%p138_p2)
}
   0xa   :  { %s142_s23 = scalar_lea.vmem %s28_s13, 128  ;;  %p147_p4 = scmp.lt.s32.totalorder %s28_s13, %s28_s13 }
   0xb   :  { %p143_p3 = scmp.ne.s32.totalorder %s28_s13, %s142_s23  ;;  %p148_p5 = scmp.lt.s32.totalorder %s142_s23, %s142_s23 }
   0xd   :  { %p149_p6 = por %p148_p5, %p147_p4 }
   0xf   :  { %p150_p7 = pnand %p149_p6, %p143_p3 }
  0x11   :  { %153 = shalt.err (!%p150_p7)
}
  0x12   :  { %30 = dma.hbm_to_vmem [thread:$0]  %s304_s1, 128, %s28_s13, [#allocation6]  }
  0x13   :  { %s154_s28 = scalar_lea.hbm %s303_s0, 128 }
  0x14   :  { %p155_p8 = scmp.ne.s32.totalorder %s303_s0, %s154_s28  ;;  %p158_p9 = scmp.lt.u32.totalorder %s154_s28, %s303_s0 }
  0x16   :  { %p160_p10 = pnand %p158_p9, %p155_p8 }
  0x18   :  { %163 = shalt.err (!%p160_p10)
}
  0x19   :  { %s164_s6 = scalar_lea.vmem %s18_s15, 128  ;;  %p169_p12 = scmp.lt.s32.totalorder %s18_s15, %s18_s15 }
  0x1a   :  { %p165_p11 = scmp.ne.s32.totalorder %s18_s15, %s164_s6  ;;  %p170_p13 = scmp.lt.s32.totalorder %s164_s6, %s164_s6 }
  0x1c   :  { %p171_p0 = por %p170_p13, %p169_p12 }
  0x1e   :  { %p172_p1 = pnand %p171_p0, %p165_p11 }
  0x20   :  { %175 = shalt.err (!%p172_p1)
}
  0x21   :  { %20 = dma.hbm_to_vmem [thread:$0]  %s303_s0, 128, %s18_s15, [#allocation3]  }
  0x22   :  { %s228_s8 = smov [#allocation7]   ;;  %s176_s12 = scalar_lea.hbm %s305_s2, 128 }
  0x23   :  { %s37_s9 = sshll.u32 %s228_s8, 4  ;;  %p177_p2 = scmp.ne.s32.totalorder %s305_s2, %s176_s12  ;;  %s38_s9 = int_to_ptr.vmem [resolvable:$true] %s37_s9 }
  0x24   :  { %p180_p3 = scmp.lt.u32.totalorder %s176_s12, %s305_s2 }
  0x26   :  { %p182_p4 = pnand %p180_p3, %p177_p2 }
  0x28   :  { %185 = shalt.err (!%p182_p4)
}
  0x29   :  { %s186_s18 = scalar_lea.vmem %s38_s9, 128  ;;  %p191_p6 = scmp.lt.s32.totalorder %s38_s9, %s38_s9 }
  0x2a   :  { %p187_p5 = scmp.ne.s32.totalorder %s38_s9, %s186_s18  ;;  %p192_p7 = scmp.lt.s32.totalorder %s186_s18, %s186_s18 }
  0x2c   :  { %p193_p8 = por %p192_p7, %p191_p6 }
  0x2e   :  { %p194_p9 = pnand %p193_p8, %p187_p5 }
  0x30   :  { %197 = shalt.err (!%p194_p9)
}
  0x31   :  { %40 = dma.hbm_to_vmem [thread:$0]  %s305_s2, 128, %s38_s9, [#allocation6]  }
  0x32   :  { %220 = dma.done.wait [#allocation3], 128  }
  0x33   :  { %221 = vsyncadd [#allocation3], 4294967168 }
  0x34   :  { %222 = dma.done.wait [#allocation6], 256  }
  0x35   :  { %223 = vsyncadd [#allocation6], 4294967040  ;;  %v51_v0 = vld [vmem:[#allocation5] sm:$0xff]  ;;  %vm54_vm0 = vcmask 261120   ;;  %v52_v1 = vld [vmem:[#allocation7] sm:$0xff]  ;;  %vm91_vm1 = vcmask 7168  }
  0x36   :  { %v50_v2 = vld [vmem:[#allocation2] sm:$0xff]  ;;  %v66_v3 = vmul.f32 %v51_v0, %v51_v0  ;;  %v70_v4 = vmul.f32 %v52_v1, %v52_v1  ;;  %s229_s2 = smov [#allocation8]  }
  0x37   :  { %v62_v5 = vmul.f32 %v50_v2, %v50_v2  ;;  %v53_v6 = vmul.f32 %v51_v0, %v50_v2  ;;  %v58_v11 = vmul.f32 %v52_v1, %v50_v2  ;;  %s110_s19 = sshll.u32 %s229_s2, 4  ;;  %s111_s19 = int_to_ptr.vmem [resolvable:$true] %s110_s19 }
  0x38   :  { %v67_v7 = vsel %vm54_vm0, %v66_v3, 0.0  ;;  %v71_v9 = vsel %vm54_vm0, %v70_v4, 0.0  ;;  %s198_s21 = scalar_lea.vmem %s111_s19, 128  ;;  %p203_p11 = scmp.lt.s32.totalorder %s111_s19, %s111_s19 }
  0x39   :  { %v63_v8 = vsel %vm54_vm0, %v62_v5, 0.0  ;;  %68 = vadd.xlane.f32.xlu0 %v67_v7  ;;  %v55_v10 = vsel %vm54_vm0, %v53_v6, 0.0  ;;  %v59_v12 = vsel %vm54_vm0, %v58_v11, 0.0  ;;  %p199_p10 = scmp.ne.s32.totalorder %s111_s19, %s198_s21  ;;  %p204_p12 = scmp.lt.s32.totalorder %s198_s21, %s198_s21 }
  0x3a   :  { %64 = vadd.xlane.f32.xlu1 %v63_v8 }
  0x3b   :  { %p205_p13 = por %p204_p12, %p203_p11 }
  0x3d   :  { %72 = vadd.xlane.f32.xlu0 %v71_v9  ;;  %p206_p0 = pnand %p205_p13, %p199_p10 }
  0x3e   :  { %56 = vadd.xlane.f32.xlu1 %v55_v10 }
  0x41   :  { %60 = vadd.xlane.f32.xlu0 %v59_v12 }
  0xc6   :  { %v69_v13 = vpop.xlane.xlu0 %68 }
  0xc7   :  { %126 = vrsqrt.f32 %v69_v13  ;;  %v65_v15 = vpop.xlane.xlu1 %64 }
  0xca   :  { %v73_v14 = vpop.xlane.xlu0 %72 }
  0xcb   :  { %128 = vrsqrt.f32 %v73_v14  ;;  %v57_v17 = vpop.xlane.xlu1 %56 }
  0xcc   :  { %130 = vrsqrt.f32 %v65_v15 }
  0xce   :  { %v61_v18 = vpop.xlane.xlu0 %60 }
  0xd1   :  { %v127_v16 = vpop.eup %126 }
  0xd2   :  { %v78_v20 = vmul.f32 %v127_v16, %v57_v17 }
  0xd5   :  { %v129_v19 = vpop.eup %128 }
  0xd6   :  { %v77_v21 = vmul.f32 %v129_v19, %v61_v18  ;;  %v131_v22 = vpop.eup %130 }
  0xd8   :  { %v79_v23 = vsub.f32 %v77_v21, %v78_v20 }
  0xda   :  { %v80_v24 = vmul.f32 %v131_v22, %v79_v23 }
  0xdc   :  { %v81_v25 = vadd.f32 0.5, %v80_v24 }
  0xde   :  { %v82_v26 = vmax.f32 %v81_v25, 0.0 }
  0xe0   :  { %v83_v27 = vmul.f32 0.5, %v82_v26 }
  0xe2   :  { %v92_v28 = vsel %vm91_vm1, %v83_v27, 0.0 }
  0xe3   :  { %93 = vadd.xlane.f32.xlu1 %v92_v28 }
 0x170   :  { %v94_v29 = vpop.xlane.xlu1 %93 }
 0x171   :  { %v95_v30 = vrot.slane %v94_v29, 4 }
 0x173   :  { %v96_v31 = vadd.f32 %v95_v30, %v94_v29 }
 0x175   :  { %v97_v32 = vrot.slane %v96_v31, 2 }
 0x177   :  { %v98_v33 = vadd.f32 %v97_v32, %v96_v31 }
 0x179   :  { %v99_v34 = vrot.slane %v98_v33, 1 }
 0x17b   :  { %v100_v35 = vadd.f32 %v99_v34, %v98_v33 }
 0x17d   :  { %120 = vpush %v100_v35 }
 0x1ae   :  { %s121_s20 = spop %120 }
 0x1af   :  { %v102_v36 = vstv %s121_s20 }
 0x1b0   :  { %103 = vst [vmem:[#allocation8] sm:$0xff] %v102_v36 }
 0x1b1   :  { %209 = shalt.err (!%p206_p0)
}
 0x1b2   :  { %s210_s24 = scalar_lea.hbm %s306_s3, 128 }
 0x1b3   :  { %p211_p1 = scmp.ne.s32.totalorder %s306_s3, %s210_s24  ;;  %p214_p2 = scmp.lt.u32.totalorder %s210_s24, %s306_s3 }
 0x1b5   :  { %p216_p3 = pnand %p214_p2, %p211_p1 }
 0x1b7   :  { %219 = shalt.err (!%p216_p3)
}
 0x1b8   :  { %113 = dma.vmem_to_hbm [thread:$0]  %s111_s19, 128, %s306_s3, [#allocation4]  }
 0x1b9   :  { %224 = dma.done.wait [#allocation4], 128  }
 0x1ba   :  { %225 = vsyncadd [#allocation4], 4294967168 }
 0x1bb   :  { %117 = vsyncpa [#allocation3], 1 }
 0x1bc   :  { %118 = vsyncpa [#allocation6], 1 }
 0x1bd   :  { %119 = vsyncpa [#allocation4], 1 }

</bundles_post_ra>
